<compile_context>
chip_gen: v7x
topology: tpu7x:2x2x1
jax: 0.10.0
libtpu: 0.0.40
codegen_flags: <defaults>
</compile_context>

<pallas_src>
import functools

import jax
import jax.numpy as jnp
from jax.experimental import pallas as pl
from jax.experimental.pallas import tpu as pltpu


# ----------------------------- kernel ---------------------------------------


def _make_qnet_kernel(bf16_epilogue):
    """Fused 3-matmul MLP kernel. bf16 MXU operands, f32 accumulation.
    Epilogue (bias + ReLU) in bf16 on v6e/v7x, f32 on v5e."""

    def kernel(x_ref, w1_ref, b1_ref, w2_ref, b2_ref, w3_ref, b3_ref, q_ref):
        # layer 1: cast x to bf16 in-kernel (hidden under the matmul)
        x = x_ref[...].astype(jnp.bfloat16)
        h = jnp.dot(x, w1_ref[...], preferred_element_type=jnp.float32)
        if bf16_epilogue:
            h = jnp.maximum(h.astype(jnp.bfloat16) + b1_ref[...], 0.0)
        else:
            h = jnp.maximum(h + b1_ref[...], 0.0).astype(jnp.bfloat16)

        # layer 2
        h = jnp.dot(h, w2_ref[...], preferred_element_type=jnp.float32)
        if bf16_epilogue:
            h = jnp.maximum(h.astype(jnp.bfloat16) + b2_ref[...], 0.0)
        else:
            h = jnp.maximum(h + b2_ref[...], 0.0)

        # output layer: dueling algebra pre-folded into w3/b3 (kept in f32 so
        # bf16 rounding cannot swallow the advantage differences / argmax)
        q = jnp.dot(h.astype(jnp.float32), w3_ref[...],
                    preferred_element_type=jnp.float32) + b3_ref[...]
        q_ref[...] = q.astype(q_ref.dtype)

    return kernel


# ----------------------------- chip detection --------------------------------


def _tpu_generation():
    """(multi_core_per_chip, has_bf16_vpu) from the device kind string.
    Conservative fallbacks: single-core, f32 epilogue (always correct)."""
    kind = ""
    try:
        kind = (jax.devices()[0].device_kind or "").lower()
    except Exception:
        pass
    is_v7 = ("v7" in kind) or ("tpu7" in kind) or ("7x" in kind)
    is_v6 = "v6" in kind
    multi_core = is_v7                      # 2 TensorCores per chip only on v7x
    bf16_epilogue = is_v6 or is_v7          # bf16 VALU on v6e / v7x, not v5e
    return multi_core, bf16_epilogue


# ----------------------------- param prep (hoisted, run once) ----------------


def prepare_qnet_params(params, *, dueling, bf16_epilogue):
    """Fold the dueling head into the last Linear, pad output lanes to a
    multiple of 128, and cast matmul operands to bf16. Run once per parameter
    set, NOT per forward call."""
    f32, bf16 = jnp.float32, jnp.bfloat16
    ew = bf16 if bf16_epilogue else f32

    w1 = params["w1"].astype(bf16)
    b1 = params["b1"].astype(ew)
    w2 = params["w2"].astype(bf16)
    b2 = params["b2"].astype(ew)

    if dueling:
        # q = (h @ wa + ba) - mean_j(h @ wa + ba) + (h @ wv^T + bv)
        #   = h @ (wv^T + wa - mean_j(wa)) + (bv + ba - mean(ba))   (exact)
        wv, bv = params["wv"].astype(f32), params["bv"].astype(f32)
        wa, ba = params["wa"].astype(f32), params["ba"].astype(f32)
        w3 = wv.T + (wa - jnp.mean(wa, axis=1, keepdims=True))
        b3 = bv + (ba - jnp.mean(ba, axis=1, keepdims=True))
    else:
        w3 = params["w3"].astype(f32)
        b3 = params["b3"].astype(f32)

    out_size = int(w3.shape[1])
    out_pad = max(128, ((out_size + 127) // 128) * 128)   # lane-dense output
    if out_pad != out_size:
        w3 = jnp.pad(w3, ((0, 0), (0, out_pad - out_size)))
        b3 = jnp.pad(b3, ((0, 0), (0, out_pad - out_size)))

    prep = {"w1": w1, "b1": b1, "w2": w2, "b2": b2, "w3": w3, "b3": b3}
    return prep, out_size


# ----------------------------- block sizing ----------------------------------


def _round_up_16(n):
    return ((n + 15) // 16) * 16


def _choose_block_b(B, *, multi_core, max_block=1024):
    """Batch tile. Single tile on single-core chips (v5e/v6e) and for small
    batches on v7x; split 2-way on v7x only when per-tile work beats the
    per-grid-step overhead (B >= 512). Multiple of 16 (full bf16 vregs)."""
    if multi_core and B >= 512:
        return int(min(max_block, _round_up_16((B + 1) // 2)))
    return int(min(max_block, max(16, _round_up_16(B))))


# ----------------------------- forward wrapper --------------------------------


def discrete_action_q_forward(x, prep, *, out_size, bf16_epilogue,
                              multi_core=False, max_block_b=1024):
    """Forward pass. x: [B, input_size] float32. prep: prepare_qnet_params()."""
    B, F = x.shape
    w1, b1 = prep["w1"], prep["b1"]
    w2, b2 = prep["w2"], prep["b2"]
    w3, b3 = prep["w3"], prep["b3"]
    H1, H2 = w1.shape[1], w2.shape[1]
    out_pad = w3.shape[1]

    block_b = _choose_block_b(B, multi_core=multi_core, max_block=max_block_b)
    B_pad = pl.cdiv(B, block_b) * block_b
    if B_pad != B:
        x = jnp.pad(x, ((0, B_pad - B), (0, 0)))

    def full_spec(arr):
        # constant-index full-array block: stays VMEM-resident across grid steps
        return pl.BlockSpec(arr.shape, lambda i: (0, 0))

    in_specs = [pl.BlockSpec((block_b, F), lambda i: (i, 0))] + \
               [full_spec(a) for a in (w1, b1, w2, b2, w3, b3)]
    out_spec = pl.BlockSpec((block_b, out_pad), lambda i: (i, 0))

    flops = 2 * B_pad * (F * H1 + H1 * H2 + H2 * out_pad)
    bytes_accessed = (x.size * x.dtype.itemsize
                      + B_pad * out_pad * 4
                      + sum(int(a.size) * a.dtype.itemsize
                            for a in (w1, b1, w2, b2, w3, b3)))

    q_pad = pl.pallas_call(
        _make_qnet_kernel(bf16_epilogue),
        out_shape=jax.ShapeDtypeStruct((B_pad, out_pad), jnp.float32),
        grid_spec=pltpu.PrefetchScalarGridSpec(
            num_scalar_prefetch=0,
            grid=(B_pad // block_b,),
            in_specs=in_specs,
            out_specs=out_spec,
        ),
        compiler_params=pltpu.CompilerParams(
            dimension_semantics=("parallel",)),
        cost_estimate=pl.CostEstimate(
            flops=flops, transcendentals=0, bytes_accessed=bytes_accessed),
    )(x, w1, b1, w2, b2, w3, b3)

    return q_pad[:B, :out_size]


# ----------------------------- reference ------------------------------------


def reference_forward(x, params, *, dueling):
    """Pure-JAX f32 reference matching the PyTorch module exactly."""
    h = jnp.maximum(x @ params["w1"] + params["b1"], 0.0)
    h = jnp.maximum(h @ params["w2"] + params["b2"], 0.0)
    if not dueling:
        return h @ params["w3"] + params["b3"]
    v = h @ params["wv"].T + params["bv"]
    a0 = h @ params["wa"] + params["ba"]
    return v + (a0 - jnp.mean(a0, axis=-1, keepdims=True))


# ----------------------------- param init -----------------------------------


def make_params(key, input_size, hidden_layers, output_size, dueling):
    ks = jax.random.split(key, 8)
    h1, h2 = hidden_layers
    scale = lambda fan_in: 1.0 / jnp.sqrt(jnp.float32(fan_in))
    p = {
        "w1": jax.random.normal(ks[0], (input_size, h1), jnp.float32) * scale(input_size),
        "b1": jax.random.normal(ks[1], (1, h1), jnp.float32) * 0.01,
        "w2": jax.random.normal(ks[2], (h1, h2), jnp.float32) * scale(h1),
        "b2": jax.random.normal(ks[3], (1, h2), jnp.float32) * 0.01,
    }
    if dueling:
        p["wv"] = jax.random.normal(ks[4], (1, h2), jnp.float32) * scale(h2)
        p["bv"] = jax.random.normal(ks[5], (1, 1), jnp.float32) * 0.01
        p["wa"] = jax.random.normal(ks[6], (h2, output_size), jnp.float32) * scale(h2)
        p["ba"] = jax.random.normal(ks[7], (1, output_size), jnp.float32) * 0.01
    else:
        p["w3"] = jax.random.normal(ks[4], (h2, output_size), jnp.float32) * scale(h2)
        p["b3"] = jax.random.normal(ks[5], (1, output_size), jnp.float32) * 0.01
    return p


# ----------------------------- main ------------------------------------------


if __name__ == "__main__":
    INPUT_SIZE = 32
    OUTPUT_SIZE = 16
    HIDDEN = [256, 256]
    BATCH = 64   # single grid step on v5e/v6e/v7x at this size

    multi_core, bf16_ep = _tpu_generation()

    key = jax.random.PRNGKey(0)
    kx, kp1, kp2 = jax.random.split(key, 3)
    x = jax.random.normal(kx, (BATCH, INPUT_SIZE), jnp.float32)

    ok = True
    for dueling, kparam in ((False, kp1), (True, kp2)):
        params = make_params(kparam, INPUT_SIZE, HIDDEN, OUTPUT_SIZE, dueling)

        # Hoisted (once-per-parameter-set) preprocessing: dueling fold, bf16
        # casts, 128-lane output padding.
        prep, out_size = prepare_qnet_params(params, dueling=dueling,
                                             bf16_epilogue=bf16_ep)

        fwd = jax.jit(functools.partial(
            discrete_action_q_forward, out_size=out_size,
            bf16_epilogue=bf16_ep, multi_core=multi_core))

        q = jax.block_until_ready(fwd(x, prep))
        q_ref = reference_forward(x, params, dueling=dueling)
        assert q.shape == (BATCH, OUTPUT_SIZE)

        # bf16 matmul operands -> loosened value tolerance vs the f32 reference
        ok = ok and bool(jnp.allclose(q, q_ref, atol=5e-2, rtol=5e-2))

        # Argmax (action-selection) agreement on rows whose top-2 gap exceeds
        # the numeric tolerance (review correctness concern).
        srt = jnp.sort(q_ref, axis=-1)
        confident = (srt[:, -1] - srt[:, -2]) > 1e-1
        agree = jnp.argmax(q, axis=-1) == jnp.argmax(q_ref, axis=-1)
        ok = ok and bool(jnp.all(jnp.where(confident, agree, True)))

    # TODO(synk): get_log_prob is a trivial elementwise op on forward's output;
    # not implemented as a kernel (only the module's forward is required).

    if ok:
        print("KERNEL_OK")
    else:
        print("MISMATCH")
</pallas_src>

<mosaic_0001>
module attributes {stable_mosaic.version = 11 : i64} {
  func.func @kernel(%arg0: i32, %arg1: memref<64x32xf32, #tpu.memory_space<vmem>>, %arg2: memref<32x256xbf16, #tpu.memory_space<vmem>>, %arg3: memref<1x256xf32, #tpu.memory_space<vmem>>, %arg4: memref<256x256xbf16, #tpu.memory_space<vmem>>, %arg5: memref<1x256xf32, #tpu.memory_space<vmem>>, %arg6: memref<256x128xf32, #tpu.memory_space<vmem>>, %arg7: memref<1x128xf32, #tpu.memory_space<vmem>>, %arg8: memref<64x128xf32, #tpu.memory_space<vmem>>) attributes {dimension_semantics = [#tpu.dimension_semantics<parallel>], iteration_bounds = array<i64: 1>, scalar_prefetch = 0 : i64, scratch_operands = 0 : i64, tpu.core_type = #tpu.core_type<tc>, window_params = [{transform_indices = @transform_0, window_bounds = array<i64: 64, 32>}, {pipeline_mode = #tpu.pipeline_mode<synchronous>, transform_indices = @transform_1, window_bounds = array<i64: 32, 256>}, {pipeline_mode = #tpu.pipeline_mode<synchronous>, transform_indices = @transform_2, window_bounds = array<i64: 1, 256>}, {pipeline_mode = #tpu.pipeline_mode<synchronous>, transform_indices = @transform_3, window_bounds = array<i64: 256, 256>}, {pipeline_mode = #tpu.pipeline_mode<synchronous>, transform_indices = @transform_4, window_bounds = array<i64: 1, 256>}, {pipeline_mode = #tpu.pipeline_mode<synchronous>, transform_indices = @transform_5, window_bounds = array<i64: 256, 128>}, {pipeline_mode = #tpu.pipeline_mode<synchronous>, transform_indices = @transform_6, window_bounds = array<i64: 1, 128>}, {transform_indices = @transform_7, window_bounds = array<i64: 64, 128>}]} {
    %c0 = arith.constant 0 : index
    %c0_0 = arith.constant 0 : index
    %0 = vector.load %arg1[%c0, %c0_0] : memref<64x32xf32, #tpu.memory_space<vmem>>, vector<64x32xf32>
    %1 = arith.truncf %0 : vector<64x32xf32> to vector<64x32xbf16>
    %c0_1 = arith.constant 0 : index
    %c0_2 = arith.constant 0 : index
    %2 = vector.load %arg2[%c0_1, %c0_2] : memref<32x256xbf16, #tpu.memory_space<vmem>>, vector<32x256xbf16>
    %cst = arith.constant dense<0.000000e+00> : vector<64x256xf32>
    %3 = tpu.matmul %1, %2, %cst {dimension_numbers = #tpu.dot_dimension_numbers<[1], [0], [0], [1], [0, 0, 1, 1], [], []>} : vector<64x32xbf16>, vector<32x256xbf16>, vector<64x256xf32> -> vector<64x256xf32>
    %c0_3 = arith.constant 0 : index
    %c0_4 = arith.constant 0 : index
    %4 = vector.load %arg3[%c0_3, %c0_4] : memref<1x256xf32, #tpu.memory_space<vmem>>, vector<1x256xf32>
    %5 = vector.broadcast %4 : vector<1x256xf32> to vector<64x256xf32>
    %6 = arith.addf %3, %5 : vector<64x256xf32>
    %cst_5 = arith.constant 0.000000e+00 : f32
    %7 = vector.broadcast %cst_5 : f32 to vector<64x256xf32>
    %8 = arith.maximumf %6, %7 : vector<64x256xf32>
    %9 = arith.truncf %8 : vector<64x256xf32> to vector<64x256xbf16>
    %c0_6 = arith.constant 0 : index
    %c0_7 = arith.constant 0 : index
    %10 = vector.load %arg4[%c0_6, %c0_7] : memref<256x256xbf16, #tpu.memory_space<vmem>>, vector<256x256xbf16>
    %cst_8 = arith.constant dense<0.000000e+00> : vector<64x256xf32>
    %11 = tpu.matmul %9, %10, %cst_8 {dimension_numbers = #tpu.dot_dimension_numbers<[1], [0], [0], [1], [0, 0, 1, 1], [], []>} : vector<64x256xbf16>, vector<256x256xbf16>, vector<64x256xf32> -> vector<64x256xf32>
    %c0_9 = arith.constant 0 : index
    %c0_10 = arith.constant 0 : index
    %12 = vector.load %arg5[%c0_9, %c0_10] : memref<1x256xf32, #tpu.memory_space<vmem>>, vector<1x256xf32>
    %13 = vector.broadcast %12 : vector<1x256xf32> to vector<64x256xf32>
    %14 = arith.addf %11, %13 : vector<64x256xf32>
    %cst_11 = arith.constant 0.000000e+00 : f32
    %15 = vector.broadcast %cst_11 : f32 to vector<64x256xf32>
    %16 = arith.maximumf %14, %15 : vector<64x256xf32>
    %c0_12 = arith.constant 0 : index
    %c0_13 = arith.constant 0 : index
    %17 = vector.load %arg6[%c0_12, %c0_13] : memref<256x128xf32, #tpu.memory_space<vmem>>, vector<256x128xf32>
    %cst_14 = arith.constant dense<0.000000e+00> : vector<64x128xf32>
    %18 = tpu.matmul %16, %17, %cst_14 {dimension_numbers = #tpu.dot_dimension_numbers<[1], [0], [0], [1], [0, 0, 1, 1], [], []>} : vector<64x256xf32>, vector<256x128xf32>, vector<64x128xf32> -> vector<64x128xf32>
    %c0_15 = arith.constant 0 : index
    %c0_16 = arith.constant 0 : index
    %19 = vector.load %arg7[%c0_15, %c0_16] : memref<1x128xf32, #tpu.memory_space<vmem>>, vector<1x128xf32>
    %20 = vector.broadcast %19 : vector<1x128xf32> to vector<64x128xf32>
    %21 = arith.addf %18, %20 : vector<64x128xf32>
    %c0_17 = arith.constant 0 : index
    %c0_18 = arith.constant 0 : index
    %22 = vector.load %arg8[%c0_17, %c0_18] : memref<64x128xf32, #tpu.memory_space<vmem>>, vector<64x128xf32>
    tpu.vector_store %arg8[%c0_17, %c0_18], %21 {strides = array<i32>} : memref<64x128xf32, #tpu.memory_space<vmem>>, vector<64x128xf32>,
    return
  }
  func.func @transform_0(%arg0: i32) -> (i32, i32) {
    %c0_i32 = arith.constant 0 : i32
    %c0_i32_0 = arith.constant 0 : i32
    return %arg0, %c0_i32 : i32, i32
  }
  func.func @transform_1(%arg0: i32) -> (i32, i32) {
    %c0_i32 = arith.constant 0 : i32
    %c0_i32_0 = arith.constant 0 : i32
    %c0_i32_1 = arith.constant 0 : i32
    return %c0_i32, %c0_i32_0 : i32, i32
  }
  func.func @transform_2(%arg0: i32) -> (i32, i32) {
    %c0_i32 = arith.constant 0 : i32
    %c0_i32_0 = arith.constant 0 : i32
    %c0_i32_1 = arith.constant 0 : i32
    return %c0_i32, %c0_i32_0 : i32, i32
  }
  func.func @transform_3(%arg0: i32) -> (i32, i32) {
    %c0_i32 = arith.constant 0 : i32
    %c0_i32_0 = arith.constant 0 : i32
    %c0_i32_1 = arith.constant 0 : i32
    return %c0_i32, %c0_i32_0 : i32, i32
  }
  func.func @transform_4(%arg0: i32) -> (i32, i32) {
    %c0_i32 = arith.constant 0 : i32
    %c0_i32_0 = arith.constant 0 : i32
    %c0_i32_1 = arith.constant 0 : i32
    return %c0_i32, %c0_i32_0 : i32, i32
  }
  func.func @transform_5(%arg0: i32) -> (i32, i32) {
    %c0_i32 = arith.constant 0 : i32
    %c0_i32_0 = arith.constant 0 : i32
    %c0_i32_1 = arith.constant 0 : i32
    return %c0_i32, %c0_i32_0 : i32, i32
  }
  func.func @transform_6(%arg0: i32) -> (i32, i32) {
    %c0_i32 = arith.constant 0 : i32
    %c0_i32_0 = arith.constant 0 : i32
    %c0_i32_1 = arith.constant 0 : i32
    return %c0_i32, %c0_i32_0 : i32, i32
  }
  func.func @transform_7(%arg0: i32) -> (i32, i32) {
    %c0_i32 = arith.constant 0 : i32
    %c0_i32_0 = arith.constant 0 : i32
    return %arg0, %c0_i32 : i32, i32
  }
}

</mosaic_0001>

<bundles_post_ra>
// kernel: discrete_action_q_forward.1
= control target key start
LH: loop header
LB: loop body
LE: loop exit
PB: predicated region body
PF: predicated region fallthrough
CT: control target
= control target key end

     0   :  { %12 = vsyncpa [#allocation3], 0  ;;  %s1054_s0 = inlined_call_operand.vmem [shape: f32[64,32], index: 0, kind: input, shape index: {}]   ;;  %s1055_s1 = inlined_call_operand.vmem [shape: bf16[32,256], index: 1, kind: input, shape index: {}]   ;;  %s1056_s2 = inlined_call_operand.vmem [shape: f32[1,256], index: 2, kind: input, shape index: {}]   ;;  %s1057_s3 = inlined_call_operand.hbm [shape: bf16[256,256], index: 3, kind: input, shape index: {}]   ;;  %s1058_s4 = inlined_call_operand.vmem [shape: f32[1,256], index: 4, kind: input, shape index: {}]   ;;  %s1059_s5 = inlined_call_operand.hbm [shape: f32[256,128], index: 5, kind: input, shape index: {}]   ;;  %s1060_s6 = inlined_call_operand.vmem [shape: f32[1,128], index: 6, kind: input, shape index: {}]   ;;  %s1061_s7 = inlined_call_operand.vmem [shape: f32[64,128], index: 7, kind: output, shape index: {}]  }
   0x1   :  { %13 = vsyncpa [#allocation5], 0  ;;  %s900_s24 = smov [#allocation2]   ;;  %s852_s28 = scalar_lea.hbm %s1057_s3, 4096 }
   0x2   :  { %s25_s25 = sshll.u32 %s900_s24, 4  ;;  %p853_p0 = scmp.ne.s32.totalorder %s1057_s3, %s852_s28  ;;  %s26_s25 = int_to_ptr.vmem [resolvable:$true] %s25_s25 }
   0x3   :  { %p856_p1 = scmp.lt.u32.totalorder %s852_s28, %s1057_s3 }
   0x5   :  { %p858_p2 = pnand %p856_p1, %p853_p0 }
   0x7   :  { %861 = shalt.err (!%p858_p2)
}
   0x8   :  { %s862_s10 = scalar_lea.vmem %s26_s25, 4096  ;;  %p867_p4 = scmp.lt.s32.totalorder %s26_s25, %s26_s25 }
   0x9   :  { %p863_p3 = scmp.ne.s32.totalorder %s26_s25, %s862_s10  ;;  %p868_p5 = scmp.lt.s32.totalorder %s862_s10, %s862_s10 }
   0xb   :  { %p869_p6 = por %p868_p5, %p867_p4 }
   0xd   :  { %p870_p7 = pnand %p869_p6, %p863_p3 }
   0xf   :  { %873 = shalt.err (!%p870_p7)
}
  0x10   :  { %s901_s11 = smov 128   ;;  %s902_s12 = smov 8  }
  0x11   :  { %31 = dma.hbm_to_vmem [thread:$0]  %s1057_s3, 4096, %s26_s25, [#allocation3], %s901_s11, %s901_s11, %s902_s12  }
  0x12   :  { %s903_s15 = smov [#allocation4]   ;;  %s874_s19 = scalar_lea.hbm %s1059_s5, 4096 }
  0x13   :  { %s39_s16 = sshll.u32 %s903_s15, 4  ;;  %p875_p8 = scmp.ne.s32.totalorder %s1059_s5, %s874_s19  ;;  %s40_s16 = int_to_ptr.vmem [resolvable:$true] %s39_s16 }
  0x14   :  { %p878_p9 = scmp.lt.u32.totalorder %s874_s19, %s1059_s5 }
  0x16   :  { %p880_p10 = pnand %p878_p9, %p875_p8 }
  0x18   :  { %883 = shalt.err (!%p880_p10)
}
  0x19   :  { %s884_s24 = scalar_lea.vmem %s40_s16, 4096  ;;  %p889_p12 = scmp.lt.s32.totalorder %s40_s16, %s40_s16 }
  0x1a   :  { %p885_p11 = scmp.ne.s32.totalorder %s40_s16, %s884_s24  ;;  %p890_p13 = scmp.lt.s32.totalorder %s884_s24, %s884_s24 }
  0x1c   :  { %p891_p0 = por %p890_p13, %p889_p12 }
  0x1e   :  { %p892_p1 = pnand %p891_p0, %p885_p11 }
  0x20   :  { %895 = shalt.err (!%p892_p1)
}
  0x21   :  { %45 = dma.hbm_to_vmem [thread:$0]  %s1059_s5, 4096, %s40_s16, [#allocation5], %s901_s11, %s901_s11, %s902_s12  }
  0x22   :  { %896 = dma.done.wait [#allocation3], 4096  }
  0x23   :  { %897 = vsyncadd [#allocation3], 4294963200 }
  0x24   :  { %898 = dma.done.wait [#allocation5], 4096  }
  0x25   :  { %899 = vsyncadd [#allocation5], 4294963200  ;;  %v904_v0 = vmov 0   ;;  %v798_v1 = vld [vmem:[%s1055_s1 + $0x4] ss:$8 sps:$4 sm:$0xff]   ;;  %vm103_vm0 = vcmask 261120  }
  0x26   :  { %148 = vmatprep.mubr.bf16.mxu0 %v904_v0  ;;  %v800_v2 = vld [vmem:[%s1055_s1] ss:$8 sps:$4 sm:$0xff]   ;;  %116 = vmatprep.subr.bf16.mxu0 %v798_v1  ;;  %v801_v3 = vld [vmem:[%s1055_s1 + $0x14] ss:$8 sps:$4 sm:$0xff]   ;;  %v803_v4 = vld [vmem:[%s1055_s1 + $0x10] ss:$8 sps:$4 sm:$0xff]  }
  0x27   :  { %117 = vmatpush1.bf16.msra.mxu0 %v800_v2  ;;  %v55_v5 = vld [vmem:[%s1054_s0] sm:$0xff]  ;;  %v56_v6 = vld [vmem:[%s1054_s0 + $0x8] sm:$0xff]  ;;  %v807_v10 = vld [vmem:[#allocation2 + $0x14] ss:$8 sps:$4 sm:$0xff]  }
  0x28   :  { %118 = vmatprep.subr.bf16.mxu0 %v801_v3  ;;  %v63_v7 = vpack.c.bf16 %v56_v6, %v55_v5  ;;  %v804_v8 = vld [vmem:[#allocation2 + $0x4] ss:$8 sps:$4 sm:$0xff]   ;;  %v806_v9 = vld [vmem:[#allocation2] ss:$8 sps:$4 sm:$0xff]   ;;  %v809_v11 = vld [vmem:[#allocation2 + $0x10] ss:$8 sps:$4 sm:$0xff]  }
  0x29   :  { %417 = vmatprep.subr.bf16.mxu1 %v804_v8  ;;  %v810_v12 = vld [vmem:[#allocation2 + $0x24] ss:$8 sps:$4 sm:$0xff]   ;;  %v57_v13 = vld [vmem:[%s1054_s0 + $0x10] sm:$0xff]  ;;  %v58_v14 = vld [vmem:[%s1054_s0 + $0x18] sm:$0xff] }
  0x2a   :  { %418 = vmatpush1.bf16.msra.mxu1 %v806_v9  ;;  %v812_v15 = vld [vmem:[#allocation2 + $0x20] ss:$8 sps:$4 sm:$0xff]   ;;  %v64_v16 = vpack.c.bf16 %v58_v14, %v57_v13  ;;  %v813_v17 = vld [vmem:[#allocation2 + $0x34] ss:$8 sps:$4 sm:$0xff]   ;;  %v815_v18 = vld [vmem:[#allocation2 + $0x30] ss:$8 sps:$4 sm:$0xff]  }
  0x2b   :  { %119 = vmatpush1.bf16.msra.mxu0 %v803_v4  ;;  %419 = vmatprep.subr.bf16.mxu1 %v807_v10  ;;  %v816_v19 = vld [vmem:[#allocation2 + $0x44] ss:$8 sps:$4 sm:$0xff]   ;;  %v818_v22 = vld [vmem:[#allocation2 + $0x40] ss:$8 sps:$4 sm:$0xff]   ;;  %v819_v24 = vld [vmem:[#allocation2 + $0x54] ss:$8 sps:$4 sm:$0xff]  }
  0x2c   :  { %v59_v20 = vld [vmem:[%s1054_s0 + $0x20] sm:$0xff]  ;;  %v60_v21 = vld [vmem:[%s1054_s0 + $0x28] sm:$0xff]  ;;  %v821_v25 = vld [vmem:[#allocation2 + $0x50] ss:$8 sps:$4 sm:$0xff]  }
  0x2d   :  { %v65_v23 = vpack.c.bf16 %v60_v21, %v59_v20  ;;  %v822_v26 = vld [vmem:[#allocation2 + $0x64] ss:$8 sps:$4 sm:$0xff]   ;;  %v61_v27 = vld [vmem:[%s1054_s0 + $0x30] sm:$0xff]  ;;  %v62_v28 = vld [vmem:[%s1054_s0 + $0x38] sm:$0xff] }
  0x2e   :  { %668 = vmatmul.mubr.msk.bf16.vlgmr.msra.gmra.mrb[0].mxu0 %vm103_vm0, %v63_v7  ;;  %420 = vmatpush1.bf16.msra.mxu1 %v809_v11  ;;  %v824_v29 = vld [vmem:[#allocation2 + $0x60] ss:$8 sps:$4 sm:$0xff]   ;;  %v66_v30 = vpack.c.bf16 %v62_v28, %v61_v27  ;;  %v825_v31 = vld [vmem:[#allocation2 + $0x74] ss:$8 sps:$4 sm:$0xff]   ;;  %v827_v32 = vld [vmem:[#allocation2 + $0x70] ss:$8 sps:$4 sm:$0xff]   ;;  %v73_v27 = vlaneseq }
  0x2f   :  { %158 = vmatprep.mubr.bf16.mxu0 %v904_v0  ;;  %421 = vmatprep.subr.bf16.mxu1 %v810_v12  ;;  %v828_v33 = vld [vmem:[#allocation2 + $0x84] ss:$8 sps:$4 sm:$0xff]   ;;  %v830_v34 = vld [vmem:[#allocation2 + $0x80] ss:$8 sps:$4 sm:$0xff]   ;;  %v831_v35 = vld [vmem:[#allocation2 + $0x94] ss:$8 sps:$4 sm:$0xff]  }
  0x30   :  { %v833_v36 = vld [vmem:[#allocation2 + $0x90] ss:$8 sps:$4 sm:$0xff]   ;;  %v834_v37 = vld [vmem:[#allocation2 + $0xa4] ss:$8 sps:$4 sm:$0xff]   ;;  %v836_v38 = vld [vmem:[#allocation2 + $0xa0] ss:$8 sps:$4 sm:$0xff]  }
  0x31   :  { %v837_v39 = vld [vmem:[#allocation2 + $0xb4] ss:$8 sps:$4 sm:$0xff]   ;;  %v839_v40 = vld [vmem:[#allocation2 + $0xb0] ss:$8 sps:$4 sm:$0xff]   ;;  %v840_v41 = vld [vmem:[#allocation2 + $0xc4] ss:$8 sps:$4 sm:$0xff]  }
  0x32   :  { %422 = vmatpush1.bf16.msra.mxu1 %v812_v15  ;;  %v842_v42 = vld [vmem:[#allocation2 + $0xc0] ss:$8 sps:$4 sm:$0xff]   ;;  %v843_v43 = vld [vmem:[#allocation2 + $0xd4] ss:$8 sps:$4 sm:$0xff]   ;;  %v845_v44 = vld [vmem:[#allocation2 + $0xd0] ss:$8 sps:$4 sm:$0xff]  }
  0x33   :  { %423 = vmatprep.subr.bf16.mxu1 %v813_v17  ;;  %v846_v45 = vld [vmem:[#allocation2 + $0xe4] ss:$8 sps:$4 sm:$0xff]   ;;  %v848_v46 = vld [vmem:[#allocation2 + $0xe0] ss:$8 sps:$4 sm:$0xff]   ;;  %v849_v47 = vld [vmem:[#allocation2 + $0xf4] ss:$8 sps:$4 sm:$0xff]  }
  0x34   :  { %v851_v48 = vld [vmem:[#allocation2 + $0xf0] ss:$8 sps:$4 sm:$0xff]   ;;  %v522_v49 = vld [vmem:[#allocation4 + $0x80] sm:$0xff]  ;;  %v523_v50 = vld [vmem:[#allocation4 + $0x88] sm:$0xff]  ;;  %v1009_v28 = vshrl.u32 %v73_v27, 7 }
  0x35   :  { %v506_v51 = vld [vmem:[#allocation4] sm:$0xff]  ;;  %v761_v52 = vpack.c.bf16 %v523_v50, %v522_v49  ;;  %v507_v53 = vld [vmem:[#allocation4 + $0x8] sm:$0xff]  ;;  %v524_v54 = vld [vmem:[#allocation4 + $0x90] sm:$0xff] }
  0x36   :  { %669 = vmatmul.mubr.msk.bf16.gmra.mrb[4].mxu0 %vm103_vm0, %v64_v16  ;;  %424 = vmatpush1.bf16.msra.mxu1 %v815_v18  ;;  %v525_v55 = vld [vmem:[#allocation4 + $0x98] sm:$0xff]  ;;  %v763_v56 = vpack.c.bf16 %v507_v53, %v506_v51  ;;  %v508_v58 = vld [vmem:[#allocation4 + $0x10] sm:$0xff]  ;;  %v526_v60 = vld [vmem:[#allocation4 + $0xa0] sm:$0xff] }
  0x37   :  { %168 = vmatprep.mubr.bf16.mxu0 %v904_v0  ;;  %425 = vmatprep.subr.bf16.mxu1 %v816_v19  ;;  %v765_v57 = vpack.c.bf16 %v525_v55, %v524_v54  ;;  %v509_v59 = vld [vmem:[#allocation4 + $0x18] sm:$0xff]  ;;  %v527_v61 = vld [vmem:[#allocation4 + $0xa8] sm:$0xff]  ;;  %v528_v2 = vld [vmem:[#allocation4 + $0xb0] sm:$0xff] }
  0x38   :  { %762 = vmatprep.subr.bf16.mxu0 %v761_v52  ;;  %v767_v62 = vpack.c.bf16 %v509_v59, %v508_v58  ;;  %v769_v63 = vpack.c.bf16 %v527_v61, %v526_v60  ;;  %v511_v1 = vld [vmem:[#allocation4 + $0x28] sm:$0xff]  ;;  %v529_v3 = vld [vmem:[#allocation4 + $0xb8] sm:$0xff]  ;;  %v512_v6 = vld [vmem:[#allocation4 + $0x30] sm:$0xff] }
  0x39   :  { %764 = vmatpush3.bf16.msra.mxu0 %v763_v56  ;;  %v773_v5 = vpack.c.bf16 %v529_v3, %v528_v2  ;;  %v513_v7 = vld [vmem:[#allocation4 + $0x38] sm:$0xff]  ;;  %v530_v8 = vld [vmem:[#allocation4 + $0xc0] sm:$0xff]  ;;  %v531_v9 = vld [vmem:[#allocation4 + $0xc8] sm:$0xff] }
  0x3a   :  { %426 = vmatpush1.bf16.msra.mxu1 %v818_v22  ;;  %766 = vmatprep.subr.bf16.mxu0 %v765_v57  ;;  %v775_v10 = vpack.c.bf16 %v513_v7, %v512_v6  ;;  %v777_v11 = vpack.c.bf16 %v531_v9, %v530_v8  ;;  %v514_v12 = vld [vmem:[#allocation4 + $0x40] sm:$0xff]  ;;  %v515_v13 = vld [vmem:[#allocation4 + $0x48] sm:$0xff]  ;;  %v532_v14 = vld [vmem:[#allocation4 + $0xd0] sm:$0xff] }
  0x3b   :  { %427 = vmatprep.subr.bf16.mxu1 %v819_v24  ;;  %v533_v15 = vld [vmem:[#allocation4 + $0xd8] sm:$0xff]  ;;  %v779_v16 = vpack.c.bf16 %v515_v13, %v514_v12  ;;  %v516_v18 = vld [vmem:[#allocation4 + $0x50] sm:$0xff]  ;;  %v534_v20 = vld [vmem:[#allocation4 + $0xe0] sm:$0xff] }
  0x3c   :  { %v781_v17 = vpack.c.bf16 %v533_v15, %v532_v14  ;;  %v517_v19 = vld [vmem:[#allocation4 + $0x58] sm:$0xff]  ;;  %v535_v21 = vld [vmem:[#allocation4 + $0xe8] sm:$0xff]  ;;  %v518_v24 = vld [vmem:[#allocation4 + $0x60] sm:$0xff] }
  0x3d   :  { %768 = vmatpush3.bf16.msra.mxu0 %v767_v62  ;;  %v783_v22 = vpack.c.bf16 %v517_v19, %v516_v18  ;;  %v537_v27 = vld [vmem:[#allocation4 + $0xf8] sm:$0xff] }
  0x3e   :  { %670 = vmatmul.mubr.msk.bf16.gmra.mrb[8].mxu0 %vm103_vm0, %v65_v23  ;;  %428 = vmatpush1.bf16.msra.mxu1 %v821_v25  ;;  %v785_v23 = vpack.c.bf16 %v535_v21, %v534_v20  ;;  %v519_v25 = vld [vmem:[#allocation4 + $0x68] sm:$0xff] }
  0x3f   :  { %178 = vmatprep.mubr.bf16.mxu0 %v904_v0  ;;  %429 = vmatprep.subr.bf16.mxu1 %v822_v26  ;;  %v510_v0 = vld [vmem:[#allocation4 + $0x20] sm:$0xff]  ;;  %v787_v26 = vpack.c.bf16 %v519_v25, %v518_v24 }
  0x40   :  { %v771_v4 = vpack.c.bf16 %v511_v1, %v510_v0  ;;  %770 = vmatprep.subr.bf16.mxu0 %v769_v63 }
  0x42   :  { %430 = vmatpush1.bf16.msra.mxu1 %v824_v29  ;;  %772 = vmatpush3.bf16.msra.mxu0 %v771_v4  ;;  %v75_v29 = vsub.s32 0, %v1009_v28 }
  0x43   :  { %431 = vmatprep.subr.bf16.mxu1 %v825_v31  ;;  %774 = vmatprep.subr.bf16.mxu0 %v773_v5  ;;  %v79_v31 = vsub.s32 1, %v1009_v28 }
  0x46   :  { %671 = vmatmul.mubr.msk.bf16.gmra.mrb[12].mxu0 %vm103_vm0, %v66_v30  ;;  %432 = vmatpush1.bf16.msra.mxu1 %v827_v32  ;;  %v71_v30 = vld [vmem:[%s1056_s2] sm:$0x3] }
  0x47   :  { %433 = vmatprep.subr.bf16.mxu1 %v828_v33  ;;  %776 = vmatpush3.bf16.msra.mxu0 %v775_v10  ;;  %v76_v32 = vrot.slane %v71_v30, %v75_v29  ;;  %v80_v33 = vrot.slane %v71_v30, %v79_v31 }
  0x48   :  { %778 = vmatprep.subr.bf16.mxu0 %v777_v11 }
  0x4a   :  { %434 = vmatpush1.bf16.msra.mxu1 %v830_v34 }
  0x4b   :  { %435 = vmatprep.subr.bf16.mxu1 %v831_v35  ;;  %780 = vmatpush3.bf16.msra.mxu0 %v779_v16 }
  0x4c   :  { %782 = vmatprep.subr.bf16.mxu0 %v781_v17 }
  0x4e   :  { %436 = vmatpush1.bf16.msra.mxu1 %v833_v36 }
  0x4f   :  { %437 = vmatprep.subr.bf16.mxu1 %v834_v37  ;;  %784 = vmatpush3.bf16.msra.mxu0 %v783_v22 }
  0x50   :  { %786 = vmatprep.subr.bf16.mxu0 %v785_v23 }
  0x52   :  { %438 = vmatpush1.bf16.msra.mxu1 %v836_v38 }
  0x53   :  { %439 = vmatprep.subr.bf16.mxu1 %v837_v39  ;;  %788 = vmatpush3.bf16.msra.mxu0 %v787_v26  ;;  %v536_v26 = vld [vmem:[#allocation4 + $0xf0] sm:$0xff] }
  0x54   :  { %v789_v30 = vpack.c.bf16 %v537_v27, %v536_v26 }
  0x56   :  { %440 = vmatpush1.bf16.msra.mxu1 %v839_v40  ;;  %790 = vmatprep.subr.bf16.mxu0 %v789_v30 }
  0x57   :  { %441 = vmatprep.subr.bf16.mxu1 %v840_v41 }
  0x5a   :  { %442 = vmatpush1.bf16.msra.mxu1 %v842_v42 }
  0x5b   :  { %443 = vmatprep.subr.bf16.mxu1 %v843_v43 }
  0x5e   :  { %444 = vmatpush1.bf16.msra.mxu1 %v845_v44 }
  0x5f   :  { %445 = vmatprep.subr.bf16.mxu1 %v846_v45 }
  0x62   :  { %446 = vmatpush1.bf16.msra.mxu1 %v848_v46 }
  0x63   :  { %447 = vmatprep.subr.bf16.mxu1 %v849_v47 }
  0x66   :  { %448 = vmatpush1.bf16.msra.mxu1 %v851_v48 }
 0x101   :  { %v150_v34 = vpop.f32.mrb[0].mxu0 }
 0x102   :  { %v151_v35 = vadd.f32 %v150_v34, %v76_v32  ;;  %v152_v36 = vpop.f32.mrb[1].mxu0  ;;  %v520_v34 = vld [vmem:[#allocation4 + $0x70] sm:$0xff] }
 0x103   :  { %v153_v37 = vadd.f32 %v152_v36, %v80_v33  ;;  %v154_v38 = vpop.f32.mrb[2].mxu0 }
 0x104   :  { %v155_v39 = vadd.f32 %v154_v38, %v76_v32  ;;  %v156_v40 = vpop.f32.mrb[3].mxu0  ;;  %v189_v42 = vmax.f32 %v151_v35, 0.0  ;;  %v521_v35 = vld [vmem:[#allocation4 + $0x78] sm:$0xff] }
 0x105   :  { %v157_v41 = vadd.f32 %v156_v40, %v80_v33  ;;  %v190_v44 = vmax.f32 %v153_v37, 0.0  ;;  %v791_v36 = vpack.c.bf16 %v521_v35, %v520_v34 }
 0x106   :  { %v191_v43 = vmax.f32 %v155_v39, 0.0 }
 0x107   :  { %v192_v45 = vmax.f32 %v157_v41, 0.0  ;;  %792 = vmatpush3.bf16.msra.mxu0 %v791_v36 }
 0x108   :  { %v205_v46 = vpack.c.bf16 %v191_v43, %v189_v42 }
 0x109   :  { %v160_v47 = vpop.f32.mrb[4].mxu0  ;;  %v206_v48 = vpack.c.bf16 %v192_v45, %v190_v44 }
 0x10a   :  { %v161_v49 = vadd.f32 %v160_v47, %v76_v32  ;;  %v162_v50 = vpop.f32.mrb[5].mxu0 }
 0x10b   :  { %v163_v51 = vadd.f32 %v162_v50, %v80_v33  ;;  %v164_v52 = vpop.f32.mrb[6].mxu0  ;;  %449 = vmatprep.mubr.bf16.mxu1 %v206_v48 }
 0x10c   :  { %v165_v53 = vadd.f32 %v164_v52, %v76_v32  ;;  %v166_v54 = vpop.f32.mrb[7].mxu0  ;;  %450 = vmatmul.mubr.bf16.vlgmr.msra.gmra.mrb[0].mxu1 %v205_v46  ;;  %v193_v56 = vmax.f32 %v161_v49, 0.0 }
 0x10d   :  { %v167_v55 = vadd.f32 %v166_v54, %v80_v33  ;;  %v194_v58 = vmax.f32 %v163_v51, 0.0 }
 0x10e   :  { %v195_v57 = vmax.f32 %v165_v53, 0.0 }
 0x10f   :  { %v196_v59 = vmax.f32 %v167_v55, 0.0 }
 0x110   :  { %v207_v60 = vpack.c.bf16 %v195_v57, %v193_v56 }
 0x111   :  { %v208_v61 = vpack.c.bf16 %v196_v59, %v194_v58  ;;  %v170_v62 = vpop.f32.mrb[8].mxu0 }
 0x112   :  { %v171_v63 = vadd.f32 %v170_v62, %v76_v32  ;;  %v172_v0 = vpop.f32.mrb[9].mxu0 }
 0x113   :  { %v173_v1 = vadd.f32 %v172_v0, %v80_v33  ;;  %v174_v2 = vpop.f32.mrb[10].mxu0  ;;  %459 = vmatprep.mubr.bf16.mxu1 %v208_v61 }
 0x114   :  { %v175_v3 = vadd.f32 %v174_v2, %v76_v32  ;;  %v176_v4 = vpop.f32.mrb[11].mxu0  ;;  %460 = vmatmul.mubr.bf16.gmra.mrb[4].mxu1 %v207_v60  ;;  %v197_v6 = vmax.f32 %v171_v63, 0.0 }
 0x115   :  { %v177_v5 = vadd.f32 %v176_v4, %v80_v33  ;;  %v198_v8 = vmax.f32 %v173_v1, 0.0 }
 0x116   :  { %v199_v7 = vmax.f32 %v175_v3, 0.0 }
 0x117   :  { %v200_v9 = vmax.f32 %v177_v5, 0.0 }
 0x118   :  { %v209_v10 = vpack.c.bf16 %v199_v7, %v197_v6 }
 0x119   :  { %v210_v11 = vpack.c.bf16 %v200_v9, %v198_v8  ;;  %v180_v12 = vpop.f32.mrb[12].mxu0 }
 0x11a   :  { %v181_v13 = vadd.f32 %v180_v12, %v76_v32  ;;  %v182_v14 = vpop.f32.mrb[13].mxu0 }
 0x11b   :  { %v183_v15 = vadd.f32 %v182_v14, %v80_v33  ;;  %v184_v16 = vpop.f32.mrb[14].mxu0  ;;  %469 = vmatprep.mubr.bf16.mxu1 %v210_v11 }
 0x11c   :  { %v185_v17 = vadd.f32 %v184_v16, %v76_v32  ;;  %v186_v18 = vpop.f32.mrb[15].mxu0  ;;  %470 = vmatmul.mubr.bf16.gmra.mrb[8].mxu1 %v209_v10  ;;  %v201_v20 = vmax.f32 %v181_v13, 0.0  ;;  %v245_v32 = vld [vmem:[%s1058_s4] sm:$0x3] }
 0x11d   :  { %v187_v19 = vadd.f32 %v186_v18, %v80_v33  ;;  %v202_v22 = vmax.f32 %v183_v15, 0.0  ;;  %v250_v33 = vrot.slane %v245_v32, %v75_v29  ;;  %v254_v37 = vrot.slane %v245_v32, %v79_v31 }
 0x11e   :  { %v203_v21 = vmax.f32 %v185_v17, 0.0 }
 0x11f   :  { %v204_v23 = vmax.f32 %v187_v19, 0.0 }
 0x120   :  { %v211_v24 = vpack.c.bf16 %v203_v21, %v201_v20  ;;  %v704_v20 = vld [vmem:[%s1060_s6] ss:$0 sm:$0xff] }
 0x121   :  { %v212_v25 = vpack.c.bf16 %v204_v23, %v202_v22 }
 0x123   :  { %479 = vmatprep.mubr.bf16.mxu1 %v212_v25 }
 0x124   :  { %480 = vmatmul.mubr.bf16.gmra.mrb[12].mxu1 %v211_v24 }
 0x1df   :  { %v451_v38 = vpop.f32.mrb[0].mxu1 }
 0x1e0   :  { %v452_v39 = vadd.f32 %v451_v38, %v250_v33  ;;  %v453_v40 = vpop.f32.mrb[1].mxu1 }
 0x1e1   :  { %v454_v41 = vadd.f32 %v453_v40, %v254_v37  ;;  %v455_v42 = vpop.f32.mrb[2].mxu1 }
 0x1e2   :  { %v457_v43 = vpop.f32.mrb[3].mxu1  ;;  %v490_v46 = vmax.f32 %v452_v39, 0.0  ;;  %v456_v47 = vadd.f32 %v455_v42, %v250_v33 }
 0x1e3   :  { %v491_v44 = vmax.f32 %v454_v41, 0.0  ;;  %v458_v45 = vadd.f32 %v457_v43, %v254_v37 }
 0x1e4   :  { %v492_v50 = vmax.f32 %v456_v47, 0.0 }
 0x1e5   :  { %v493_v48 = vmax.f32 %v458_v45, 0.0  ;;  %609 = vmatprep.mubr.f32.mxu0 %v491_v44 }
 0x1e6   :  { %610 = vmatmul.mubr.f32.vlgmr.msra.gmra.mrb[16].mxu0 %v490_v46 }
 0x1e7   :  { %v461_v49 = vpop.f32.mrb[4].mxu1  ;;  %614 = vmatprep.mubr.f32.mxu0 %v493_v48 }
 0x1e8   :  { %v462_v29 = vadd.f32 %v461_v49, %v250_v33  ;;  %v463_v51 = vpop.f32.mrb[5].mxu1 }
 0x1e9   :  { %v464_v28 = vadd.f32 %v463_v51, %v254_v37  ;;  %v465_v31 = vpop.f32.mrb[6].mxu1 }
 0x1ea   :  { %v467_v52 = vpop.f32.mrb[7].mxu1  ;;  %615 = vmatmul.mubr.f32.gmra.mrb[18].mxu0 %v492_v50  ;;  %v494_v55 = vmax.f32 %v462_v29, 0.0  ;;  %v466_v56 = vadd.f32 %v465_v31, %v250_v33 }
 0x1eb   :  { %v495_v53 = vmax.f32 %v464_v28, 0.0  ;;  %v468_v54 = vadd.f32 %v467_v52, %v254_v37 }
 0x1ec   :  { %v496_v59 = vmax.f32 %v466_v56, 0.0 }
 0x1ed   :  { %v497_v57 = vmax.f32 %v468_v54, 0.0  ;;  %619 = vmatprep.mubr.f32.mxu0 %v495_v53 }
 0x1ee   :  { %620 = vmatmul.mubr.f32.gmra.mrb[20].mxu0 %v494_v55 }
 0x1ef   :  { %v471_v58 = vpop.f32.mrb[8].mxu1  ;;  %624 = vmatprep.mubr.f32.mxu0 %v497_v57 }
 0x1f0   :  { %v472_v60 = vadd.f32 %v471_v58, %v250_v33  ;;  %v473_v61 = vpop.f32.mrb[9].mxu1 }
 0x1f1   :  { %v474_v62 = vadd.f32 %v473_v61, %v254_v37  ;;  %v475_v63 = vpop.f32.mrb[10].mxu1 }
 0x1f2   :  { %v477_v0 = vpop.f32.mrb[11].mxu1  ;;  %625 = vmatmul.mubr.f32.gmra.mrb[22].mxu0 %v496_v59  ;;  %v498_v3 = vmax.f32 %v472_v60, 0.0  ;;  %v476_v4 = vadd.f32 %v475_v63, %v250_v33 }
 0x1f3   :  { %v499_v1 = vmax.f32 %v474_v62, 0.0  ;;  %v478_v2 = vadd.f32 %v477_v0, %v254_v37 }
 0x1f4   :  { %v500_v7 = vmax.f32 %v476_v4, 0.0 }
 0x1f5   :  { %v501_v5 = vmax.f32 %v478_v2, 0.0  ;;  %629 = vmatprep.mubr.f32.mxu0 %v499_v1 }
 0x1f6   :  { %630 = vmatmul.mubr.f32.gmra.mrb[24].mxu0 %v498_v3 }
 0x1f7   :  { %v481_v6 = vpop.f32.mrb[12].mxu1  ;;  %634 = vmatprep.mubr.f32.mxu0 %v501_v5 }
 0x1f8   :  { %v482_v8 = vadd.f32 %v481_v6, %v250_v33  ;;  %v483_v9 = vpop.f32.mrb[13].mxu1 }
 0x1f9   :  { %v484_v10 = vadd.f32 %v483_v9, %v254_v37  ;;  %v485_v11 = vpop.f32.mrb[14].mxu1 }
 0x1fa   :  { %v487_v12 = vpop.f32.mrb[15].mxu1  ;;  %635 = vmatmul.mubr.f32.gmra.mrb[26].mxu0 %v500_v7  ;;  %v502_v15 = vmax.f32 %v482_v8, 0.0  ;;  %v486_v16 = vadd.f32 %v485_v11, %v250_v33 }
 0x1fb   :  { %v503_v13 = vmax.f32 %v484_v10, 0.0  ;;  %v488_v14 = vadd.f32 %v487_v12, %v254_v37 }
 0x1fc   :  { %v504_v18 = vmax.f32 %v486_v16, 0.0 }
 0x1fd   :  { %v505_v17 = vmax.f32 %v488_v14, 0.0  ;;  %639 = vmatprep.mubr.f32.mxu0 %v503_v13 }
 0x1fe   :  { %640 = vmatmul.mubr.f32.gmra.mrb[28].mxu0 %v502_v15 }
 0x1ff   :  { %644 = vmatprep.mubr.f32.mxu0 %v505_v17 }
 0x202   :  { %645 = vmatmul.mubr.f32.gmra.mrb[30].mxu0 %v504_v18 }
 0x2b9   :  { %v737_v19 = vpop.f32.mrb[16].mxu0 }
 0x2ba   :  { %v738_v21 = vpop.f32.mrb[17].mxu0 }
 0x2bb   :  { %v739_v22 = vadd.f32 %v738_v21, %v737_v19 }
 0x2bd   :  { %v612_v23 = vadd.f32 %v739_v22, %v704_v20  ;;  %v740_v24 = vpop.f32.mrb[18].mxu0 }
 0x2be   :  { %v741_v25 = vpop.f32.mrb[19].mxu0 }
 0x2bf   :  { %650 = vst [vmem:[%s1061_s7] sm:$0xff] %v612_v23  ;;  %v742_v26 = vadd.f32 %v741_v25, %v740_v24 }
 0x2c1   :  { %v617_v27 = vadd.f32 %v742_v26, %v704_v20  ;;  %v743_v30 = vpop.f32.mrb[20].mxu0 }
 0x2c2   :  { %v744_v34 = vpop.f32.mrb[21].mxu0 }
 0x2c3   :  { %651 = vst [vmem:[%s1061_s7 + $0x8] sm:$0xff] %v617_v27  ;;  %v745_v35 = vadd.f32 %v744_v34, %v743_v30 }
 0x2c5   :  { %v622_v36 = vadd.f32 %v745_v35, %v704_v20  ;;  %v746_v32 = vpop.f32.mrb[22].mxu0 }
 0x2c6   :  { %v747_v33 = vpop.f32.mrb[23].mxu0 }
 0x2c7   :  { %652 = vst [vmem:[%s1061_s7 + $0x10] sm:$0xff] %v622_v36  ;;  %v748_v37 = vadd.f32 %v747_v33, %v746_v32 }
 0x2c9   :  { %v627_v38 = vadd.f32 %v748_v37, %v704_v20  ;;  %v749_v39 = vpop.f32.mrb[24].mxu0 }
 0x2ca   :  { %v750_v40 = vpop.f32.mrb[25].mxu0 }
 0x2cb   :  { %653 = vst [vmem:[%s1061_s7 + $0x18] sm:$0xff] %v627_v38  ;;  %v751_v41 = vadd.f32 %v750_v40, %v749_v39 }
 0x2cd   :  { %v632_v42 = vadd.f32 %v751_v41, %v704_v20  ;;  %v752_v43 = vpop.f32.mrb[26].mxu0 }
 0x2ce   :  { %v753_v44 = vpop.f32.mrb[27].mxu0 }
 0x2cf   :  { %654 = vst [vmem:[%s1061_s7 + $0x20] sm:$0xff] %v632_v42  ;;  %v754_v45 = vadd.f32 %v753_v44, %v752_v43 }
 0x2d1   :  { %v637_v46 = vadd.f32 %v754_v45, %v704_v20  ;;  %v755_v47 = vpop.f32.mrb[28].mxu0 }
 0x2d2   :  { %v756_v48 = vpop.f32.mrb[29].mxu0 }
 0x2d3   :  { %655 = vst [vmem:[%s1061_s7 + $0x28] sm:$0xff] %v637_v46  ;;  %v757_v49 = vadd.f32 %v756_v48, %v755_v47 }
 0x2d5   :  { %v642_v50 = vadd.f32 %v757_v49, %v704_v20  ;;  %v758_v29 = vpop.f32.mrb[30].mxu0 }
 0x2d6   :  { %v759_v51 = vpop.f32.mrb[31].mxu0 }
 0x2d7   :  { %656 = vst [vmem:[%s1061_s7 + $0x30] sm:$0xff] %v642_v50  ;;  %v760_v28 = vadd.f32 %v759_v51, %v758_v29 }
 0x2d9   :  { %v647_v31 = vadd.f32 %v760_v28, %v704_v20 }
 0x2db   :  { %657 = vst [vmem:[%s1061_s7 + $0x38] sm:$0xff] %v647_v31 }
 0x2dc   :  { %662 = vsyncpa [#allocation3], 1 }
 0x2dd   :  { %663 = vsyncpa [#allocation5], 1 }

</bundles_post_ra>
